<compile_context>
chip_gen: v5e
topology: v5e:2x2
jax: 0.10.0
libtpu: 0.0.40
codegen_flags: <defaults>
</compile_context>

<pallas_src>
import functools
import math

import jax
import jax.numpy as jnp
from jax.experimental import pallas as pl
from jax.experimental.pallas import tpu as pltpu


def _node_self_attention_kernel(x_ref, wqkv_ref, bqkv_ref, wo_ref, bo_ref,
                                o_ref, o_heads_ref, *, num_heads, clustering):
    """One grid step == `bt` batch elements, fully fused:
    QKV projection -> per-head batched attention -> single output projection."""
    bt, n, hidden = x_ref.shape
    d = hidden // num_heads
    scale = 1.0 / math.sqrt(hidden)      # reference divides by sqrt(hidden_dim)
    cdt = wqkv_ref.dtype                 # MXU input dtype (bf16 or f32)

    # ---- fused Q|K|V projection for the whole block: one wide MXU GEMM ----
    xf = x_ref[...].reshape(bt * n, hidden)                       # cheap: n % 8 == 0
    qkv = (jnp.dot(xf, wqkv_ref[...], preferred_element_type=jnp.float32)
           + bqkv_ref[...]).astype(cdt)                           # cast ONCE after bias
    qkv3 = qkv.reshape(bt, n, 3 * hidden)                         # [bt, N, 3H]

    axis = 1 if clustering else 2        # clustering=True -> softmax over queries

    # Static unroll over heads only; everything inside is batched over bt.
    for h in range(num_heads):
        c0 = h * d
        qh = qkv3[:, :, c0:c0 + d]                                # [bt, N, d]
        kh = qkv3[:, :, hidden + c0:hidden + c0 + d]              # [bt, N, d]
        vh = qkv3[:, :, 2 * hidden + c0:2 * hidden + c0 + d]      # [bt, N, d]

        # contract both operands on the last dim (flash-attention pattern, no K transpose)
        scores = jnp.einsum('bqd,bkd->bqk', qh, kh,
                            preferred_element_type=jnp.float32) * scale   # [bt, Nq, Nk] f32
        m = jnp.max(scores, axis=axis, keepdims=True)
        e = jnp.exp(scores - m)
        a = e * pl.reciprocal(jnp.sum(e, axis=axis, keepdims=True), approx=True)

        o_heads_ref[:, :, c0:c0 + d] = jnp.einsum(
            'bqk,bkd->bqd', a.astype(cdt), vh,
            preferred_element_type=jnp.float32).astype(cdt)       # [bt, N, d]

    # ---- single full-depth output projection over the whole block ----
    of = o_heads_ref[...].reshape(bt * n, hidden)                 # head-concat, [bt*N, H]
    out = jnp.dot(of, wo_ref[...], preferred_element_type=jnp.float32) + bo_ref[...]
    o_ref[...] = out.reshape(bt, n, hidden).astype(o_ref.dtype)   # one coalesced store


def _pick_batch_block(batch, per_elem_bytes, target_bytes):
    """Largest divisor of `batch` whose per-step VMEM footprint stays under target,
    capped at batch//2 so the parallel grid axis has >=2 steps (v7x megacore)."""
    cap = max(1, target_bytes // max(1, per_elem_bytes))
    cap = min(cap, max(1, batch // 2))
    best = 1
    for cand in range(1, batch + 1):
        if batch % cand == 0 and cand <= cap:
            best = cand
    return best


def node_self_attention(x, mask, params, num_heads, clustering=True,
                        compute_dtype=jnp.bfloat16, batch_block=None,
                        target_block_bytes=2 << 20):
    """Pallas-backed forward of NodeSelfAttention.

    x: [B, N, H] float32, mask: [B, N] bool, params: (wq, bq, wk, bk, wv, bv, wo, bo)
    with weights in PyTorch (out, in) layout. Output is returned in x.dtype.

    NOTE: the reference forward computes `inf_mask` and never adds it to the
    attention scores (dead code), so `mask` is intentionally NOT applied here.
    """
    del mask
    B, N, H = x.shape
    assert H % num_heads == 0, "hidden_dim must be divisible by num_heads"
    wq, bq, wk, bk, wv, bv, wo, bo = params

    # Fused QKV weight (H_in, 3H_out) and bias (1, 3H); weights pre-transposed so the
    # kernel computes y = x @ W + b. Weights/x cast to the MXU compute dtype; biases
    # stay f32 (added to the f32 MXU accumulator before the single downcast).
    wqkv = jnp.concatenate([wq.T, wk.T, wv.T], axis=1).astype(compute_dtype)   # [H, 3H]
    bqkv = jnp.concatenate([bq, bk, bv])[None, :].astype(jnp.float32)          # [1, 3H]
    wo_t = wo.T.astype(compute_dtype)                                          # [H, H]
    bo_r = bo[None, :].astype(jnp.float32)                                     # [1, H]
    x_c = x.astype(compute_dtype)

    itemsize = jnp.dtype(compute_dtype).itemsize
    out_itemsize = jnp.dtype(x.dtype).itemsize
    # Per batch element, VMEM resident through the kernel: double-buffered x block,
    # qkv intermediate (3H wide), head-output scratch, double-buffered output block,
    # and the f32 scores/probs.
    per_elem = (2 * N * H * itemsize + 3 * N * H * itemsize + N * H * itemsize
                + 2 * N * H * out_itemsize + 2 * N * N * 4)
    if batch_block is None:
        batch_block = _pick_batch_block(B, per_elem, target_block_bytes)
    assert B % batch_block == 0

    weight_bytes = 2 * (H * 3 * H + H * H + 4 * H) * itemsize     # double-buffered weights
    est = batch_block * per_elem + weight_bytes
    vmem_limit = int(min(32 << 20, max(16 << 20, 2 * est)))

    kernel = functools.partial(_node_self_attention_kernel,
                               num_heads=num_heads, clustering=clustering)

    return pl.pallas_call(
        kernel,
        out_shape=jax.ShapeDtypeStruct((B, N, H), x.dtype),
        grid=(B // batch_block,),
        in_specs=[
            pl.BlockSpec((batch_block, N, H), lambda g: (g, 0, 0)),   # x
            pl.BlockSpec((H, 3 * H), lambda g: (0, 0)),               # fused Wqkv
            pl.BlockSpec((1, 3 * H), lambda g: (0, 0)),               # fused bqkv
            pl.BlockSpec((H, H), lambda g: (0, 0)),                   # Wo
            pl.BlockSpec((1, H), lambda g: (0, 0)),                   # bo
        ],
        out_specs=pl.BlockSpec((batch_block, N, H), lambda g: (g, 0, 0)),
        scratch_shapes=[pltpu.VMEM((batch_block, N, H), compute_dtype)],  # head-concat buffer
        compiler_params=pltpu.CompilerParams(
            dimension_semantics=("parallel",),
            vmem_limit_bytes=vmem_limit),
    )(x_c, wqkv, bqkv, wo_t, bo_r)


def _reference(x, params, num_heads, clustering=True):
    """Pure-JAX mirror of the PyTorch forward, for correctness checking."""
    wq, bq, wk, bk, wv, bv, wo, bo = params
    B, N, H = x.shape
    d = H // num_heads
    q = x @ wq.T + bq
    k = x @ wk.T + bk
    v = x @ wv.T + bv
    # heads stacked along batch (head-major), as torch.cat(split(...), dim=0)
    qh = jnp.concatenate([q[:, :, h * d:(h + 1) * d] for h in range(num_heads)], axis=0)
    kh = jnp.concatenate([k[:, :, h * d:(h + 1) * d] for h in range(num_heads)], axis=0)
    vh = jnp.concatenate([v[:, :, h * d:(h + 1) * d] for h in range(num_heads)], axis=0)
    scores = jnp.einsum("bqd,bkd->bqk", qh, kh) / math.sqrt(H)
    axis = 1 if clustering else -1
    a = jax.nn.softmax(scores, axis=axis)
    o = jnp.einsum("bqk,bkd->bqd", a, vh)          # [num_heads*B, N, d]
    o = jnp.concatenate([o[h * B:(h + 1) * B] for h in range(num_heads)], axis=2)  # [B, N, H]
    return o @ wo.T + bo


if __name__ == "__main__":
    B, N, H, HEADS = 2, 8, 32, 4
    key = jax.random.PRNGKey(0)
    keys = jax.random.split(key, 10)
    bound = 1.0 / math.sqrt(H)

    def u(k, shape):
        return jax.random.uniform(k, shape, jnp.float32, -bound, bound)

    # PyTorch nn.Linear default init shapes: weight (out, in), bias (out,)
    wq, bq = u(keys[0], (H, H)), u(keys[1], (H,))
    wk, bk = u(keys[2], (H, H)), u(keys[3], (H,))
    wv, bv = u(keys[4], (H, H)), u(keys[5], (H,))
    wo, bo = u(keys[6], (H, H)), u(keys[7], (H,))
    params = (wq, bq, wk, bk, wv, bv, wo, bo)

    x = jax.random.normal(keys[8], (B, N, H), jnp.float32)
    mask = jnp.ones((B, N), dtype=bool)

    ref_c = _reference(x, params, HEADS, clustering=True)
    ref_nc = _reference(x, params, HEADS, clustering=False)

    # f32 compute path (approx reciprocal in softmax -> modest tolerance)
    out32 = jax.block_until_ready(
        node_self_attention(x, mask, params, HEADS, clustering=True,
                            compute_dtype=jnp.float32))
    assert out32.shape == (B, N, H)
    assert jnp.allclose(out32, ref_c, atol=5e-3, rtol=5e-3), "f32 clustering mismatch"

    out32_nc = jax.block_until_ready(
        node_self_attention(x, mask, params, HEADS, clustering=False,
                            compute_dtype=jnp.float32))
    assert jnp.allclose(out32_nc, ref_nc, atol=5e-3, rtol=5e-3), "f32 non-clustering mismatch"

    # default bf16 MXU path (f32 accumulation), looser tolerance vs f32 reference
    out_bf16 = jax.block_until_ready(
        node_self_attention(x, mask, params, HEADS, clustering=True))
    assert out_bf16.shape == (B, N, H)
    assert jnp.allclose(out_bf16, ref_c, atol=5e-2, rtol=5e-2), "bf16 mismatch"

    print("KERNEL_OK")
</pallas_src>

<mosaic_0001>
module attributes {stable_mosaic.version = 11 : i64} {
  func.func @_node_self_attention_kernel(%arg0: i32, %arg1: memref<1x8x32xf32, #tpu.memory_space<vmem>>, %arg2: memref<32x96xf32, #tpu.memory_space<vmem>>, %arg3: memref<1x96xf32, #tpu.memory_space<vmem>>, %arg4: memref<32x32xf32, #tpu.memory_space<vmem>>, %arg5: memref<1x32xf32, #tpu.memory_space<vmem>>, %arg6: memref<1x8x32xf32, #tpu.memory_space<vmem>>, %arg7: memref<1x8x32xf32, #tpu.memory_space<vmem>>) attributes {dimension_semantics = [#tpu.dimension_semantics<parallel>], iteration_bounds = array<i64: 2>, scalar_prefetch = 0 : i64, scratch_operands = 1 : i64, tpu.core_type = #tpu.core_type<tc>, window_params = [{transform_indices = @transform_0, window_bounds = array<i64: 1, 8, 32>}, {pipeline_mode = #tpu.pipeline_mode<synchronous>, transform_indices = @transform_1, window_bounds = array<i64: 32, 96>}, {pipeline_mode = #tpu.pipeline_mode<synchronous>, transform_indices = @transform_2, window_bounds = array<i64: 1, 96>}, {pipeline_mode = #tpu.pipeline_mode<synchronous>, transform_indices = @transform_3, window_bounds = array<i64: 32, 32>}, {pipeline_mode = #tpu.pipeline_mode<synchronous>, transform_indices = @transform_4, window_bounds = array<i64: 1, 32>}, {transform_indices = @transform_5, window_bounds = array<i64: 1, 8, 32>}]} {
    %c0 = arith.constant 0 : index
    %c0_0 = arith.constant 0 : index
    %c0_1 = arith.constant 0 : index
    %0 = vector.load %arg1[%c0, %c0_0, %c0_1] : memref<1x8x32xf32, #tpu.memory_space<vmem>>, vector<1x8x32xf32>
    %1 = vector.shape_cast %0 : vector<1x8x32xf32> to vector<8x32xf32>
    %c0_2 = arith.constant 0 : index
    %c0_3 = arith.constant 0 : index
    %2 = vector.load %arg2[%c0_2, %c0_3] : memref<32x96xf32, #tpu.memory_space<vmem>>, vector<32x96xf32>
    %cst = arith.constant dense<0.000000e+00> : vector<8x96xf32>
    %3 = tpu.matmul %1, %2, %cst {dimension_numbers = #tpu.dot_dimension_numbers<[1], [0], [0], [1], [0, 0, 1, 1], [], []>} : vector<8x32xf32>, vector<32x96xf32>, vector<8x96xf32> -> vector<8x96xf32>
    %c0_4 = arith.constant 0 : index
    %c0_5 = arith.constant 0 : index
    %4 = vector.load %arg3[%c0_4, %c0_5] : memref<1x96xf32, #tpu.memory_space<vmem>>, vector<1x96xf32>
    %5 = vector.broadcast %4 : vector<1x96xf32> to vector<8x96xf32>
    %6 = arith.addf %3, %5 : vector<8x96xf32>
    %7 = vector.shape_cast %6 : vector<8x96xf32> to vector<1x8x96xf32>
    %8 = vector.extract_strided_slice %7 {offsets = [0, 0, 0], sizes = [1, 8, 8], strides = [1, 1, 1]} : vector<1x8x96xf32> to vector<1x8x8xf32>
    %9 = vector.extract_strided_slice %7 {offsets = [0, 0, 32], sizes = [1, 8, 8], strides = [1, 1, 1]} : vector<1x8x96xf32> to vector<1x8x8xf32>
    %10 = vector.extract_strided_slice %7 {offsets = [0, 0, 64], sizes = [1, 8, 8], strides = [1, 1, 1]} : vector<1x8x96xf32> to vector<1x8x8xf32>
    "tpu.trace_start"() <{level = 10 : i32, message = "bqd,bkd->bqk"}> : () -> ()
    %cst_6 = arith.constant dense<0.000000e+00> : vector<1x8x8xf32>
    %11 = tpu.matmul %8, %9, %cst_6 {dimension_numbers = #tpu.dot_dimension_numbers<[2], [2], [1], [1], [0, 0, 0, 1, 1, 1], [0], [0]>} : vector<1x8x8xf32>, vector<1x8x8xf32>, vector<1x8x8xf32> -> vector<1x8x8xf32>
    "tpu.trace_stop"() : () -> ()
    %cst_7 = arith.constant 0.176776692 : f32
    %12 = vector.broadcast %cst_7 : f32 to vector<1x8x8xf32>
    %13 = arith.mulf %11, %12 : vector<1x8x8xf32>
    %cst_8 = arith.constant dense<0xFF800000> : vector<1x8xf32>
    %14 = vector.multi_reduction <maximumf>, %13, %cst_8 [1] : vector<1x8x8xf32> to vector<1x8xf32>
    %15 = vector.shape_cast %14 : vector<1x8xf32> to vector<1x1x8xf32>
    %16 = vector.broadcast %15 : vector<1x1x8xf32> to vector<1x8x8xf32>
    %17 = arith.subf %13, %16 : vector<1x8x8xf32>
    %18 = math.exp %17 : vector<1x8x8xf32>
    %cst_9 = arith.constant dense<0.000000e+00> : vector<1x8xf32>
    %19 = vector.multi_reduction <add>, %18, %cst_9 [1] : vector<1x8x8xf32> to vector<1x8xf32>
    %20 = vector.shape_cast %19 : vector<1x8xf32> to vector<1x1x8xf32>
    %21 = tpu.reciprocal %20 {approx = true} : vector<1x1x8xf32> -> vector<1x1x8xf32>
    %22 = vector.broadcast %21 : vector<1x1x8xf32> to vector<1x8x8xf32>
    %23 = arith.mulf %18, %22 : vector<1x8x8xf32>
    "tpu.trace_start"() <{level = 10 : i32, message = "bqk,bkd->bqd"}> : () -> ()
    %cst_10 = arith.constant dense<0.000000e+00> : vector<1x8x8xf32>
    %24 = tpu.matmul %23, %10, %cst_10 {dimension_numbers = #tpu.dot_dimension_numbers<[2], [1], [1], [2], [0, 0, 0, 1, 1, 2], [0], [0]>} : vector<1x8x8xf32>, vector<1x8x8xf32>, vector<1x8x8xf32> -> vector<1x8x8xf32>
    "tpu.trace_stop"() : () -> ()
    %c0_11 = arith.constant 0 : index
    %c0_12 = arith.constant 0 : index
    %c0_13 = arith.constant 0 : index
    %25 = vector.load %arg7[%c0_11, %c0_12, %c0_13] : memref<1x8x32xf32, #tpu.memory_space<vmem>>, vector<1x8x8xf32>
    tpu.vector_store %arg7[%c0_11, %c0_12, %c0_13], %24 {strides = array<i32>} : memref<1x8x32xf32, #tpu.memory_space<vmem>>, vector<1x8x8xf32>,
    %26 = vector.extract_strided_slice %7 {offsets = [0, 0, 8], sizes = [1, 8, 8], strides = [1, 1, 1]} : vector<1x8x96xf32> to vector<1x8x8xf32>
    %27 = vector.extract_strided_slice %7 {offsets = [0, 0, 40], sizes = [1, 8, 8], strides = [1, 1, 1]} : vector<1x8x96xf32> to vector<1x8x8xf32>
    %28 = vector.extract_strided_slice %7 {offsets = [0, 0, 72], sizes = [1, 8, 8], strides = [1, 1, 1]} : vector<1x8x96xf32> to vector<1x8x8xf32>
    "tpu.trace_start"() <{level = 10 : i32, message = "bqd,bkd->bqk"}> : () -> ()
    %cst_14 = arith.constant dense<0.000000e+00> : vector<1x8x8xf32>
    %29 = tpu.matmul %26, %27, %cst_14 {dimension_numbers = #tpu.dot_dimension_numbers<[2], [2], [1], [1], [0, 0, 0, 1, 1, 1], [0], [0]>} : vector<1x8x8xf32>, vector<1x8x8xf32>, vector<1x8x8xf32> -> vector<1x8x8xf32>
    "tpu.trace_stop"() : () -> ()
    %cst_15 = arith.constant 0.176776692 : f32
    %30 = vector.broadcast %cst_15 : f32 to vector<1x8x8xf32>
    %31 = arith.mulf %29, %30 : vector<1x8x8xf32>
    %cst_16 = arith.constant dense<0xFF800000> : vector<1x8xf32>
    %32 = vector.multi_reduction <maximumf>, %31, %cst_16 [1] : vector<1x8x8xf32> to vector<1x8xf32>
    %33 = vector.shape_cast %32 : vector<1x8xf32> to vector<1x1x8xf32>
    %34 = vector.broadcast %33 : vector<1x1x8xf32> to vector<1x8x8xf32>
    %35 = arith.subf %31, %34 : vector<1x8x8xf32>
    %36 = math.exp %35 : vector<1x8x8xf32>
    %cst_17 = arith.constant dense<0.000000e+00> : vector<1x8xf32>
    %37 = vector.multi_reduction <add>, %36, %cst_17 [1] : vector<1x8x8xf32> to vector<1x8xf32>
    %38 = vector.shape_cast %37 : vector<1x8xf32> to vector<1x1x8xf32>
    %39 = tpu.reciprocal %38 {approx = true} : vector<1x1x8xf32> -> vector<1x1x8xf32>
    %40 = vector.broadcast %39 : vector<1x1x8xf32> to vector<1x8x8xf32>
    %41 = arith.mulf %36, %40 : vector<1x8x8xf32>
    "tpu.trace_start"() <{level = 10 : i32, message = "bqk,bkd->bqd"}> : () -> ()
    %cst_18 = arith.constant dense<0.000000e+00> : vector<1x8x8xf32>
    %42 = tpu.matmul %41, %28, %cst_18 {dimension_numbers = #tpu.dot_dimension_numbers<[2], [1], [1], [2], [0, 0, 0, 1, 1, 2], [0], [0]>} : vector<1x8x8xf32>, vector<1x8x8xf32>, vector<1x8x8xf32> -> vector<1x8x8xf32>
    "tpu.trace_stop"() : () -> ()
    %c0_19 = arith.constant 0 : index
    %c0_20 = arith.constant 0 : index
    %c8 = arith.constant 8 : index
    %43 = vector.load %arg7[%c0_19, %c0_20, %c8] : memref<1x8x32xf32, #tpu.memory_space<vmem>>, vector<1x8x8xf32>
    tpu.vector_store %arg7[%c0_19, %c0_20, %c8], %42 {strides = array<i32>} : memref<1x8x32xf32, #tpu.memory_space<vmem>>, vector<1x8x8xf32>,
    %44 = vector.extract_strided_slice %7 {offsets = [0, 0, 16], sizes = [1, 8, 8], strides = [1, 1, 1]} : vector<1x8x96xf32> to vector<1x8x8xf32>
    %45 = vector.extract_strided_slice %7 {offsets = [0, 0, 48], sizes = [1, 8, 8], strides = [1, 1, 1]} : vector<1x8x96xf32> to vector<1x8x8xf32>
    %46 = vector.extract_strided_slice %7 {offsets = [0, 0, 80], sizes = [1, 8, 8], strides = [1, 1, 1]} : vector<1x8x96xf32> to vector<1x8x8xf32>
    "tpu.trace_start"() <{level = 10 : i32, message = "bqd,bkd->bqk"}> : () -> ()
    %cst_21 = arith.constant dense<0.000000e+00> : vector<1x8x8xf32>
    %47 = tpu.matmul %44, %45, %cst_21 {dimension_numbers = #tpu.dot_dimension_numbers<[2], [2], [1], [1], [0, 0, 0, 1, 1, 1], [0], [0]>} : vector<1x8x8xf32>, vector<1x8x8xf32>, vector<1x8x8xf32> -> vector<1x8x8xf32>
    "tpu.trace_stop"() : () -> ()
    %cst_22 = arith.constant 0.176776692 : f32
    %48 = vector.broadcast %cst_22 : f32 to vector<1x8x8xf32>
    %49 = arith.mulf %47, %48 : vector<1x8x8xf32>
    %cst_23 = arith.constant dense<0xFF800000> : vector<1x8xf32>
    %50 = vector.multi_reduction <maximumf>, %49, %cst_23 [1] : vector<1x8x8xf32> to vector<1x8xf32>
    %51 = vector.shape_cast %50 : vector<1x8xf32> to vector<1x1x8xf32>
    %52 = vector.broadcast %51 : vector<1x1x8xf32> to vector<1x8x8xf32>
    %53 = arith.subf %49, %52 : vector<1x8x8xf32>
    %54 = math.exp %53 : vector<1x8x8xf32>
    %cst_24 = arith.constant dense<0.000000e+00> : vector<1x8xf32>
    %55 = vector.multi_reduction <add>, %54, %cst_24 [1] : vector<1x8x8xf32> to vector<1x8xf32>
    %56 = vector.shape_cast %55 : vector<1x8xf32> to vector<1x1x8xf32>
    %57 = tpu.reciprocal %56 {approx = true} : vector<1x1x8xf32> -> vector<1x1x8xf32>
    %58 = vector.broadcast %57 : vector<1x1x8xf32> to vector<1x8x8xf32>
    %59 = arith.mulf %54, %58 : vector<1x8x8xf32>
    "tpu.trace_start"() <{level = 10 : i32, message = "bqk,bkd->bqd"}> : () -> ()
    %cst_25 = arith.constant dense<0.000000e+00> : vector<1x8x8xf32>
    %60 = tpu.matmul %59, %46, %cst_25 {dimension_numbers = #tpu.dot_dimension_numbers<[2], [1], [1], [2], [0, 0, 0, 1, 1, 2], [0], [0]>} : vector<1x8x8xf32>, vector<1x8x8xf32>, vector<1x8x8xf32> -> vector<1x8x8xf32>
    "tpu.trace_stop"() : () -> ()
    %c0_26 = arith.constant 0 : index
    %c0_27 = arith.constant 0 : index
    %c16 = arith.constant 16 : index
    %61 = vector.load %arg7[%c0_26, %c0_27, %c16] : memref<1x8x32xf32, #tpu.memory_space<vmem>>, vector<1x8x8xf32>
    tpu.vector_store %arg7[%c0_26, %c0_27, %c16], %60 {strides = array<i32>} : memref<1x8x32xf32, #tpu.memory_space<vmem>>, vector<1x8x8xf32>,
    %62 = vector.extract_strided_slice %7 {offsets = [0, 0, 24], sizes = [1, 8, 8], strides = [1, 1, 1]} : vector<1x8x96xf32> to vector<1x8x8xf32>
    %63 = vector.extract_strided_slice %7 {offsets = [0, 0, 56], sizes = [1, 8, 8], strides = [1, 1, 1]} : vector<1x8x96xf32> to vector<1x8x8xf32>
    %64 = vector.extract_strided_slice %7 {offsets = [0, 0, 88], sizes = [1, 8, 8], strides = [1, 1, 1]} : vector<1x8x96xf32> to vector<1x8x8xf32>
    "tpu.trace_start"() <{level = 10 : i32, message = "bqd,bkd->bqk"}> : () -> ()
    %cst_28 = arith.constant dense<0.000000e+00> : vector<1x8x8xf32>
    %65 = tpu.matmul %62, %63, %cst_28 {dimension_numbers = #tpu.dot_dimension_numbers<[2], [2], [1], [1], [0, 0, 0, 1, 1, 1], [0], [0]>} : vector<1x8x8xf32>, vector<1x8x8xf32>, vector<1x8x8xf32> -> vector<1x8x8xf32>
    "tpu.trace_stop"() : () -> ()
    %cst_29 = arith.constant 0.176776692 : f32
    %66 = vector.broadcast %cst_29 : f32 to vector<1x8x8xf32>
    %67 = arith.mulf %65, %66 : vector<1x8x8xf32>
    %cst_30 = arith.constant dense<0xFF800000> : vector<1x8xf32>
    %68 = vector.multi_reduction <maximumf>, %67, %cst_30 [1] : vector<1x8x8xf32> to vector<1x8xf32>
    %69 = vector.shape_cast %68 : vector<1x8xf32> to vector<1x1x8xf32>
    %70 = vector.broadcast %69 : vector<1x1x8xf32> to vector<1x8x8xf32>
    %71 = arith.subf %67, %70 : vector<1x8x8xf32>
    %72 = math.exp %71 : vector<1x8x8xf32>
    %cst_31 = arith.constant dense<0.000000e+00> : vector<1x8xf32>
    %73 = vector.multi_reduction <add>, %72, %cst_31 [1] : vector<1x8x8xf32> to vector<1x8xf32>
    %74 = vector.shape_cast %73 : vector<1x8xf32> to vector<1x1x8xf32>
    %75 = tpu.reciprocal %74 {approx = true} : vector<1x1x8xf32> -> vector<1x1x8xf32>
    %76 = vector.broadcast %75 : vector<1x1x8xf32> to vector<1x8x8xf32>
    %77 = arith.mulf %72, %76 : vector<1x8x8xf32>
    "tpu.trace_start"() <{level = 10 : i32, message = "bqk,bkd->bqd"}> : () -> ()
    %cst_32 = arith.constant dense<0.000000e+00> : vector<1x8x8xf32>
    %78 = tpu.matmul %77, %64, %cst_32 {dimension_numbers = #tpu.dot_dimension_numbers<[2], [1], [1], [2], [0, 0, 0, 1, 1, 2], [0], [0]>} : vector<1x8x8xf32>, vector<1x8x8xf32>, vector<1x8x8xf32> -> vector<1x8x8xf32>
    "tpu.trace_stop"() : () -> ()
    %c0_33 = arith.constant 0 : index
    %c0_34 = arith.constant 0 : index
    %c24 = arith.constant 24 : index
    %79 = vector.load %arg7[%c0_33, %c0_34, %c24] : memref<1x8x32xf32, #tpu.memory_space<vmem>>, vector<1x8x8xf32>
    tpu.vector_store %arg7[%c0_33, %c0_34, %c24], %78 {strides = array<i32>} : memref<1x8x32xf32, #tpu.memory_space<vmem>>, vector<1x8x8xf32>,
    %c0_35 = arith.constant 0 : index
    %c0_36 = arith.constant 0 : index
    %c0_37 = arith.constant 0 : index
    %80 = vector.load %arg7[%c0_35, %c0_36, %c0_37] : memref<1x8x32xf32, #tpu.memory_space<vmem>>, vector<1x8x32xf32>
    %81 = vector.shape_cast %80 : vector<1x8x32xf32> to vector<8x32xf32>
    %c0_38 = arith.constant 0 : index
    %c0_39 = arith.constant 0 : index
    %82 = vector.load %arg4[%c0_38, %c0_39] : memref<32x32xf32, #tpu.memory_space<vmem>>, vector<32x32xf32>
    %cst_40 = arith.constant dense<0.000000e+00> : vector<8x32xf32>
    %83 = tpu.matmul %81, %82, %cst_40 {dimension_numbers = #tpu.dot_dimension_numbers<[1], [0], [0], [1], [0, 0, 1, 1], [], []>} : vector<8x32xf32>, vector<32x32xf32>, vector<8x32xf32> -> vector<8x32xf32>
    %c0_41 = arith.constant 0 : index
    %c0_42 = arith.constant 0 : index
    %84 = vector.load %arg5[%c0_41, %c0_42] : memref<1x32xf32, #tpu.memory_space<vmem>>, vector<1x32xf32>
    %85 = vector.broadcast %84 : vector<1x32xf32> to vector<8x32xf32>
    %86 = arith.addf %83, %85 : vector<8x32xf32>
    %87 = vector.shape_cast %86 : vector<8x32xf32> to vector<1x8x32xf32>
    %c0_43 = arith.constant 0 : index
    %c0_44 = arith.constant 0 : index
    %c0_45 = arith.constant 0 : index
    %88 = vector.load %arg6[%c0_43, %c0_44, %c0_45] : memref<1x8x32xf32, #tpu.memory_space<vmem>>, vector<1x8x32xf32>
    tpu.vector_store %arg6[%c0_43, %c0_44, %c0_45], %87 {strides = array<i32>} : memref<1x8x32xf32, #tpu.memory_space<vmem>>, vector<1x8x32xf32>,
    return
  }
  func.func @transform_0(%arg0: i32) -> (i32, i32, i32) {
    %c0_i32 = arith.constant 0 : i32
    %c0_i32_0 = arith.constant 0 : i32
    %c0_i32_1 = arith.constant 0 : i32
    return %arg0, %c0_i32, %c0_i32_0 : i32, i32, i32
  }
  func.func @transform_1(%arg0: i32) -> (i32, i32) {
    %c0_i32 = arith.constant 0 : i32
    %c0_i32_0 = arith.constant 0 : i32
    %c0_i32_1 = arith.constant 0 : i32
    return %c0_i32, %c0_i32_0 : i32, i32
  }
  func.func @transform_2(%arg0: i32) -> (i32, i32) {
    %c0_i32 = arith.constant 0 : i32
    %c0_i32_0 = arith.constant 0 : i32
    %c0_i32_1 = arith.constant 0 : i32
    return %c0_i32, %c0_i32_0 : i32, i32
  }
  func.func @transform_3(%arg0: i32) -> (i32, i32) {
    %c0_i32 = arith.constant 0 : i32
    %c0_i32_0 = arith.constant 0 : i32
    %c0_i32_1 = arith.constant 0 : i32
    return %c0_i32, %c0_i32_0 : i32, i32
  }
  func.func @transform_4(%arg0: i32) -> (i32, i32) {
    %c0_i32 = arith.constant 0 : i32
    %c0_i32_0 = arith.constant 0 : i32
    %c0_i32_1 = arith.constant 0 : i32
    return %c0_i32, %c0_i32_0 : i32, i32
  }
  func.func @transform_5(%arg0: i32) -> (i32, i32, i32) {
    %c0_i32 = arith.constant 0 : i32
    %c0_i32_0 = arith.constant 0 : i32
    %c0_i32_1 = arith.constant 0 : i32
    return %arg0, %c0_i32, %c0_i32_0 : i32, i32, i32
  }
}

</mosaic_0001>

<bundles_post_ra>
// kernel: tpu_custom_call.1
= control target key start
LH: loop header
LB: loop body
LE: loop exit
PB: predicated region body
PF: predicated region fallthrough
CT: control target
= control target key end

     0   :  { %10 = vsyncpa [#allocation4], 0  ;;  %s1281_s0 = inlined_call_operand.hbm [shape: f32[2,8,32], index: 0, kind: input, shape index: {}]   ;;  %s1282_s1 = inlined_call_operand.hbm [shape: f32[32,96], index: 1, kind: input, shape index: {}]   ;;  %s1283_s2 = inlined_call_operand.vmem [shape: f32[1,96], index: 2, kind: input, shape index: {}]   ;;  %s1284_s3 = inlined_call_operand.hbm [shape: f32[32,32], index: 3, kind: input, shape index: {}]   ;;  %s1285_s4 = inlined_call_operand.vmem [shape: f32[1,32], index: 4, kind: input, shape index: {}]   ;;  %s1286_s5 = inlined_call_operand.hbm [shape: f32[2,8,32], index: 5, kind: output, shape index: {}]  }
   0x1   :  { %12 = vsyncpa [#allocation4 + $0x1], 0 }
   0x2   :  { %13 = vsyncpa [#allocation7], 0 }
   0x3   :  { %14 = vsyncpa [#allocation5], 0 }
   0x4   :  { %16 = vsyncpa [#allocation5 + $0x1], 0  ;;  %s1102_s18 = smov 0   ;;  %s1104_s19 = smov 0  }
   0x5   :  { %s1106_s20 = smov 0   ;;  %s1108_s21 = smov 0  }
   0x6 LB: > { %s174_s24 = sshll.u32 %s1282_s1, 4  ;;  %s1126_s25 = sadd.s32 4294967295, %s1052_s21   ;;  %s1052_s21 = sphi %s1108_s21, %s1297_s21   ;;  %s1048_s20 = sphi %s1106_s20, %s1296_s20   ;;  %s1044_s19 = sphi %s1104_s19, %s1295_s19   ;;  %s1040_s18 = sphi %s1102_s18, %s1294_s18   ;;  %s175_s24 = int_to_ptr.hbm [resolvable:$true] %s174_s24 }
   0x7   : > { %p762_p0 = scmp.ge.s32.totalorder %s1052_s21, 1  ;;  %p43_p1 = scmp.eq.s32.totalorder %s1126_s25, 0 }
   0x8   : > { %p163_p2 = scmp.lt.s32.totalorder %s1052_s21, 3  ;;  %s1054_s27 = smov [#allocation6]  }
   0x9   : > { %s176_s28 = sshll.u32 %s1054_s27, 4  ;;  %s191_s6 = sshll.u32 %s1284_s3, 4  ;;  %s177_s28 = int_to_ptr.vmem [resolvable:$true] %s176_s28  ;;  %s192_s6 = int_to_ptr.hbm [resolvable:$true] %s191_s6 }
   0xa   : > { %p1131_p3 = pnand %p762_p0, %p163_p2  ;;  %s1055_s7 = smov [#allocation8]  }
   0xb   : > { %s193_s8 = sshll.u32 %s1055_s7, 4  ;;  %s1056_s9 = smov 128   ;;  %s194_s8 = int_to_ptr.vmem [resolvable:$true] %s193_s8 }
   0xc   : > { %p803_p4 = pneg %p1131_p3  ;;  %s1057_s10 = smov 8  }
   0xd   : > { %s761_s11 = sadd.s32 4294967294, %s1052_s21   ;;  %s1145_s12 = sadd.s32 1, %s1052_s21  }
   0xe   : > { %p804_p6 = pnand %p803_p4, %p43_p1  ;;  %s26_s13 = ssub.s32 %s1052_s21, %s1145_s12 }
   0xf   : > { %s29_s14 = sadd.s32 1, %s1048_s20  ;;  %p27_p7 = scmp.eq.s32.totalorder %s26_s13, 0 }
  0x10   : > { %806 = dma.hbm_to_vmem [thread:$0]  (!%p804_p6), %s175_s24, 512, %s177_s28, [#allocation7], %s1056_s9, %s1056_s9, %s1057_s10  }
  0x11   : > { %809 = dma.hbm_to_vmem [thread:$0]  (!%p804_p6), %s192_s6, 512, %s194_s8, [#allocation7], %s1056_s9, %s1056_s9, %s1057_s10  }
  0x12   : > { %p36_p8 = scmp.ne.s32.totalorder %s1048_s20, %s1044_s19  ;;  %p37_p9 = scmp.eq.s32.totalorder %s1052_s21, 0 }
  0x13   : > { %p42_p10 = scmp.ne.s32.totalorder %s1044_s19, %s1040_s18  ;;  %p150_p13 = scmp.eq.s32.totalorder %s1126_s25, 1 }
  0x14   : > { %s1156_s15 = scalar_select %p27_p7, %s1048_s20, %s29_s14  }
  0x15   : > { %p1158_p11 = por %p37_p9, %p36_p8  ;;  %p1164_p12 = por %p43_p1, %p42_p10 }
  0x16   : > { %p156_p0 = scmp.eq.s32.totalorder %s761_s11, 1  ;;  %p820_p2 = scmp.lt.s32.totalorder %s1052_s21, 2 }
  0x17   : > { %s210_s22 = sand.u32 1, %s1048_s20   ;;  %p1171_p4 = por %p150_p13, %p36_p8 }
  0x18   : > { %p1175_p6 = por %p156_p0, %p42_p10  ;;  %s766_s27 = sshll.u32 %s210_s22, 3 }
  0x19   : > { %s767_s28 = sshll.u32 %s1052_s21, 3  ;;  %s214_s7 = scalar_lea.vmem [#allocation3], %s766_s27 }
  0x1a   : > { %s218_s6 = scalar_lea.hbm %s1281_s0, %s767_s28  ;;  %s222_s8 = sshll.u32 %s214_s7, 4  ;;  %s223_s8 = int_to_ptr.vmem [resolvable:$true] %s222_s8 }
  0x1b   : > { %s220_s9 = sshll.u32 %s218_s6, 4  ;;  %p1185_p7 = pnand %p820_p2, %p1158_p11  ;;  %s221_s9 = int_to_ptr.hbm [resolvable:$true] %s220_s9 }
  0x1c   : > { %s211_s11 = scalar_lea.sflag [#allocation4], %s210_s22  ;;  %s952_s13 = sshra.s32 %s221_s9, 4  ;;  %s953_s13 = int_to_ptr.hbm [resolvable:$true] %s952_s13 }
  0x1d   : > { %s954_s14 = scalar_lea.hbm %s953_s13, 8  ;;  %p956_p9 = pneg %p1185_p7 }
  0x1e   : > { %p955_p8 = scmp.ne.s32.totalorder %s953_s13, %s954_s14  ;;  %s959_s29 = scalar_lea.hbm %s1281_s0, 16 }
  0x1f   : > { %p960_p11 = scmp.lt.s32.totalorder %s953_s13, %s1281_s0  ;;  %p961_p0 = scmp.lt.s32.totalorder %s959_s29, %s954_s14 }
  0x20   : > { %p957_p10 = pnand %p956_p9, %p955_p8 }
  0x21   : > { %p962_p2 = por %p961_p0, %p960_p11 }
  0x22   : > { %p958_p13 = pneg %p957_p10 }
  0x24   : > { %p963_p5 = pnand %p962_p2, %p958_p13 }
  0x26   : > { %966 = shalt.err (!%p963_p5)
}
  0x27   : > { %813 = dma.hbm_to_vmem [thread:$0]  (!%p1185_p7), %s221_s9, 128, %s223_s8, %s211_s11  }
  0x28   : > { %231 = sbr.rel (%p1131_p3) target bundleno = 885 (0x375), region = 40  ;;  %s1202_s22 = sand.u32 (!%p1131_p3), 1, %s1044_s19  }
  0x29   : > { %s769_s6 = sshll.u32 (!%p1131_p3), %s1202_s22, 3  ;;  %s234_s7 = scalar_lea.sflag (!%p1131_p3), [#allocation4], %s1202_s22 }
  0x2a   : > { %s237_s13 = scalar_lea.vmem (!%p1131_p3), [#allocation3], %s769_s6 }
  0x2d   : > { %1027 = dma.done.wait (%p1164_p12), %s234_s7, 128  }
  0x2e   : > { %1029 = vsyncadd (%p1164_p12), %s234_s7, 4294967168 }
  0x2f   : > { %1031 = dma.done.wait (%p43_p1), [#allocation7], 1024  }
  0x30   : > { %1033 = vsyncadd (%p43_p1), [#allocation7], 4294966272  ;;  %v279_v0 = vld [vmem:[#allocation6 + $0x18] sm:$0xff]  ;;  %v278_v1 = vld [vmem:[#allocation6 + $0x10] sm:$0xff]  ;;  %vm284_vm0 = vcmask 261120   ;;  %s1058_s8 = smov 72  }
  0x31   : > { %300 = vmatpush.msra.mxu0 %v279_v0  ;;  %v277_v2 = vld [vmem:[#allocation6 + $0x8] sm:$0xff]  ;;  %v276_v3 = vld [vmem:[#allocation6] sm:$0xff]  ;;  %v275_v4 = vld [vmem:[%s237_s13] sm:$0xff]  ;;  %s1059_s9 = smov 120   ;;  %s1060_s10 = smov 96   ;;  %vm311_vm1 = vcmask 64512  }
  0x32   : > { %v874_v5 = vld [vmem:[%s1283_s2] ss:$0 sm:$0xff]  ;;  %s1061_s11 = smov 112   ;;  %s1062_s14 = smov 80   ;;  %vm461_vm2 = vcmask 130112   ;;  %vm541_vm3 = vcmask 195712  }
  0x33   : > { %301 = vmatpush.msra.mxu0 %v278_v1  ;;  %s1063_s27 = smov 88   ;;  %s1064_s28 = smov 56   ;;  %vm621_vm4 = vcmask 261312  }
  0x34   : > { %s1065_s29 = smov 64   ;;  %s1066_s30 = smov 104  }
  0x35   : > { %302 = vmatpush.msra.mxu0 %v277_v2  ;;  %s1067_s16 = smov 40   ;;  %s1068_s7 = smov 48  }
  0x36   : > { %s1069_s13 = smov 16   ;;  %s1070_s26 = smov 8  }
  0x37   : > { %303 = vmatpush.msra.mxu0 %v276_v3  ;;  %s1071_s17 = smov 24  }
  0x38   : > { %773 = vmatmul.msk.f32.vlgmr.msra.gmra.mxu0 %vm284_vm0, %v275_v4 }
  0xb5   : > { %v305_v6 = vpop.f32.mrf.mxu0 }
  0xb6   : > { %v306_v7 = vadd.f32 %v874_v5, %v305_v6 }
  0xb8   : > { %545 = vrot.lane.b32.xlu2 %v306_v7, %s1058_s8  ;;  %383 = vrot.lane.b32.xlu1 %v306_v7, %s1059_s9  ;;  %s788_s8 = sshll.u32 %s1126_s25, 3  ;;  %s657_s25 = scalar_lea.sflag [#allocation5], %s1202_s22 }
  0xb9   : > { %309 = vrot.lane.b32.xlu0 %v306_v7, %s1060_s10 }
  0xc0   : > { %463 = vrot.lane.b32.xlu2 %v306_v7, %s1061_s11  ;;  %465 = vrot.lane.b32.xlu1 %v306_v7, %s1062_s14  ;;  %s667_s11 = scalar_lea.hbm %s1286_s5, %s788_s8 }
  0xc1   : > { %385 = vrot.lane.b32.xlu0 %v306_v7, %s1063_s27 }
  0xc8   : > { %431 = vrot.lane.b32.xlu2 %v306_v7, %s1064_s28  ;;  %356 = vrot.lane.b32.xlu1 %v306_v7, %s1065_s29  ;;  %s274_s28 = scalar_lea.vmem [#allocation9], %s769_s6  ;;  %s1002_s6 = scalar_lea.hbm %s1286_s5, 16 }
  0xc9   : > { %543 = vrot.lane.b32.xlu0 %v306_v7, %s1066_s30  ;;  %s669_s29 = sshll.u32 %s274_s28, 4  ;;  %s671_s30 = sshll.u32 %s667_s11, 4  ;;  %s670_s29 = int_to_ptr.vmem [resolvable:$true] %s669_s29  ;;  %s672_s30 = int_to_ptr.hbm [resolvable:$true] %s671_s30 }
  0xd0   : > { %591 = vrot.lane.b32.xlu1 %v306_v7, %s1067_s16  ;;  %s996_s16 = sshra.s32 %s672_s30, 4  ;;  %s997_s16 = int_to_ptr.hbm [resolvable:$true] %s996_s16 }
  0xd1   : > { %511 = vrot.lane.b32.xlu0 %v306_v7, %s1068_s7  ;;  %s998_s7 = scalar_lea.hbm %s997_s16, 8  ;;  %p1003_p12 = scmp.lt.s32.totalorder %s997_s16, %s1286_s5 }
  0xd2   : > { %p999_p1 = scmp.ne.s32.totalorder %s997_s16, %s998_s7  ;;  %p1004_p7 = scmp.lt.s32.totalorder %s1002_s6, %s998_s7 }
  0xd4   : > { %p1000_p3 = pnand %p999_p1, %p1171_p4  ;;  %p1005_p8 = por %p1004_p7, %p1003_p12 }
  0xd6   : > { %p1001_p5 = pneg %p1000_p3 }
  0xd8   : > { %p1006_p9 = pnand %p1005_p8, %p1001_p5 }
 0x112   : > { %v546_v8 = vpop.permute.xlu2 %545 }
 0x113   : > { %783 = vmatpush.xpose.msk.msrb.mxu0 %vm311_vm1, %v546_v8 }
 0x11a   : > { %v464_v11 = vpop.permute.xlu2 %463 }
 0x122   : > { %v432_v15 = vpop.permute.xlu2 %431 }
 0x12a   : > { %v384_v9 = vpop.permute.xlu1 %383 }
 0x12b   : > { %v310_v10 = vpop.permute.xlu0 %309 }
 0x12c   : > { %774 = vmatpush.xpose.msk.msra.mxu1 %vm311_vm1, %v310_v10 }
 0x12f   : > { %775 = vmatmul.msk.f32.vlgmr.msra.gmra.mxu1 %vm311_vm1, %v306_v7 }
 0x132   : > { %v466_v12 = vpop.permute.xlu1 %465 }
 0x133   : > { %v386_v13 = vpop.permute.xlu0 %385  ;;  %780 = vmatpush.xpose.msk.msrb.mxu1 %vm311_vm1, %v466_v12 }
 0x134   : > { %777 = vmatpush.xpose.msk.msra.mxu3 %vm311_vm1, %v386_v13 }
 0x137   : > { %778 = vmatmul.msk.f32.vlgmr.msra.gmra.mxu3 %vm311_vm1, %v384_v9  ;;  %781 = vmatmul.msk.f32.vlgmr.msrb.gmra.mxu1 %vm311_vm1, %v464_v11 }
 0x13a   : > { %v357_v14 = vpop.permute.xlu1 %356 }
 0x13b   : > { %v544_v16 = vpop.permute.xlu0 %543  ;;  %377 = vmatpush.msra.mxu2 %v357_v14 }
 0x13c   : > { %784 = vmatmul.msk.f32.vlgmr.msrb.gmra.mxu0 %vm311_vm1, %v544_v16 }
 0x13d   : > { %452 = vmatpush.msrb.mxu2 %v432_v15 }
 0x143   : > { %v512_v17 = vpop.permute.xlu0 %511 }
 0x144   : > { %532 = vmatpush.msrb.mxu3 %v512_v17 }
 0x1ac   : > { %v333_v18 = vpop.f32.mrf.mxu1 }
 0x1ad   : > { %v336_v19 = vmul.f32 0.17677669, %v333_v18 }
 0x1af   : > { %v337_v20 = vsel %vm311_vm1, %v336_v19, -inf }
 0x1b0   : > { %v338_v21 = vrot.slane %v337_v20, 4 }
 0x1b2   : > { %v339_v22 = vmax.f32 %v337_v20, %v338_v21 }
 0x1b4   : > { %v340_v23 = vrot.slane %v339_v22, 2  ;;  %v488_v24 = vpop.f32.mrf.mxu1 }
 0x1b5   : > { %v491_v25 = vmul.f32 0.17677669, %v488_v24 }
 0x1b6   : > { %v341_v26 = vmax.f32 %v339_v22, %v340_v23 }
 0x1b7   : > { %v492_v27 = vsel %vm311_vm1, %v491_v25, -inf }
 0x1b8   : > { %v342_v28 = vrot.slane %v341_v26, 1  ;;  %v493_v29 = vrot.slane %v492_v27, 4 }
 0x1b9   : > { %v568_v30 = vpop.f32.mrf.mxu0 }
 0x1ba   : > { %v343_v31 = vmax.f32 %v341_v26, %v342_v28  ;;  %v494_v32 = vmax.f32 %v492_v27, %v493_v29  ;;  %v571_v33 = vmul.f32 0.17677669, %v568_v30  ;;  %v408_v34 = vpop.f32.mrf.mxu3  ;;  %v592_v28 = vpop.permute.xlu1 %591 }
 0x1bb   : > { %v411_v35 = vmul.f32 0.17677669, %v408_v34 }
 0x1bc   : > { %v344_v36 = vsub.f32 %v336_v19, %v343_v31  ;;  %v495_v37 = vrot.slane %v494_v32, 2  ;;  %v572_v38 = vsel %vm311_vm1, %v571_v33, -inf }
 0x1bd   : > { %v573_v39 = vrot.slane %v572_v38, 4  ;;  %v412_v40 = vsel %vm311_vm1, %v411_v35, -inf }
 0x1be   : > { %v345_v41 = vmul.f32 1.442695, %v344_v36  ;;  %v496_v42 = vmax.f32 %v494_v32, %v495_v37  ;;  %v413_v43 = vrot.slane %v412_v40, 4 }
 0x1bf   : > { %v574_v44 = vmax.f32 %v572_v38, %v573_v39 }
 0x1c0   : > { %876 = vpow2.f32 %v345_v41  ;;  %v497_v45 = vrot.slane %v496_v42, 1  ;;  %v414_v46 = vmax.f32 %v412_v40, %v413_v43 }
 0x1c1   : > { %v575_v47 = vrot.slane %v574_v44, 2 }
 0x1c2   : > { %v498_v48 = vmax.f32 %v496_v42, %v497_v45  ;;  %v415_v49 = vrot.slane %v414_v46, 2  ;;  %v626_v45 = vld [vmem:[#allocation8 + $0x10] sm:$0xff] }
 0x1c3   : > { %v576_v50 = vmax.f32 %v574_v44, %v575_v47  ;;  %v627_v44 = vld [vmem:[#allocation8 + $0x18] sm:$0xff]  ;;  %v624_v47 = vld [vmem:[#allocation8] sm:$0xff] }
 0x1c4   : > { %v499_v51 = vsub.f32 %v491_v25, %v498_v48  ;;  %v416_v52 = vmax.f32 %v414_v46, %v415_v49  ;;  %647 = vmatpush.msra.mxu1 %v627_v44  ;;  %v625_v46 = vld [vmem:[#allocation8 + $0x8] sm:$0xff] }
 0x1c5   : > { %v577_v53 = vrot.slane %v576_v50, 1 }
 0x1c6   : > { %v877_v54 = vpop.eup %876  ;;  %v500_v55 = vmul.f32 1.442695, %v499_v51  ;;  %v417_v56 = vrot.slane %v416_v52, 1  ;;  %648 = vmatpush.msra.mxu1 %v626_v45  ;;  %v875_v51 = vld [vmem:[%s1285_s4] ss:$0 sm:$0xff] }
 0x1c7   : > { %v347_v57 = vsel %vm311_vm1, %v877_v54, 0.0  ;;  %v578_v58 = vmax.f32 %v576_v50, %v577_v53 }
 0x1c8   : > { %v348_v59 = vrot.slane %v347_v57, 4  ;;  %878 = vpow2.f32 %v500_v55  ;;  %v418_v60 = vmax.f32 %v416_v52, %v417_v56  ;;  %649 = vmatpush.msra.mxu1 %v625_v46 }
 0x1c9   : > { %v579_v61 = vsub.f32 %v571_v33, %v578_v58 }
 0x1ca   : > { %v349_v62 = vadd.f32 %v348_v59, %v347_v57  ;;  %v419_v63 = vsub.f32 %v411_v35, %v418_v60  ;;  %650 = vmatpush.msra.mxu1 %v624_v47 }
 0x1cb   : > { %v580_v0 = vmul.f32 1.442695, %v579_v61 }
 0x1cc   : > { %v350_v1 = vrot.slane %v349_v62, 2  ;;  %v420_v2 = vmul.f32 1.442695, %v419_v63 }
 0x1cd   : > { %880 = vpow2.f32 %v580_v0 }
 0x1ce   : > { %v879_v3 = vpop.eup %878  ;;  %882 = vpow2.f32 %v420_v2  ;;  %v351_v4 = vadd.f32 %v350_v1, %v349_v62 }
 0x1cf   : > { %v502_v5 = vsel %vm311_vm1, %v879_v3, 0.0 }
 0x1d0   : > { %v503_v6 = vrot.slane %v502_v5, 4  ;;  %v352_v7 = vrot.slane %v351_v4, 1 }
 0x1d2   : > { %v504_v8 = vadd.f32 %v503_v6, %v502_v5  ;;  %v353_v9 = vadd.f32 %v352_v7, %v351_v4 }
 0x1d3   : > { %v881_v10 = vpop.eup %880 }
 0x1d4   : > { %v883_v11 = vpop.eup %882  ;;  %v505_v12 = vrot.slane %v504_v8, 2  ;;  %v582_v13 = vsel %vm311_vm1, %v881_v10, 0.0  ;;  %884 = vrcp.f32 %v353_v9 }
 0x1d5   : > { %v583_v14 = vrot.slane %v582_v13, 4  ;;  %v422_v15 = vsel %vm311_vm1, %v883_v11, 0.0 }
 0x1d6   : > { %v506_v16 = vadd.f32 %v505_v12, %v504_v8  ;;  %v423_v17 = vrot.slane %v422_v15, 4 }
 0x1d7   : > { %v584_v18 = vadd.f32 %v583_v14, %v582_v13 }
 0x1d8   : > { %v507_v19 = vrot.slane %v506_v16, 1  ;;  %v424_v20 = vadd.f32 %v423_v17, %v422_v15 }
 0x1d9   : > { %v585_v21 = vrot.slane %v584_v18, 2 }
 0x1da   : > { %v885_v22 = vpop.eup %884  ;;  %v425_v23 = vrot.slane %v424_v20, 2  ;;  %v508_v24 = vadd.f32 %v507_v19, %v506_v16 }
 0x1db   : > { %v355_v25 = vmul.f32 %v885_v22, %v877_v54  ;;  %v586_v26 = vadd.f32 %v585_v21, %v584_v18 }
 0x1dc   : > { %v426_v27 = vadd.f32 %v425_v23, %v424_v20  ;;  %886 = vrcp.f32 %v508_v24 }
 0x1dd   : > { %776 = vmatmul.msk.f32.vlgmr.msra.gmra.mxu2 %vm311_vm1, %v355_v25  ;;  %v587_v30 = vrot.slane %v586_v26, 1 }
 0x1de   : > { %v427_v29 = vrot.slane %v426_v27, 1  ;;  %612 = vmatpush.msra.mxu2 %v592_v28 }
 0x1df   : > { %v588_v34 = vadd.f32 %v587_v30, %v586_v26 }
 0x1e0   : > { %v428_v31 = vadd.f32 %v427_v29, %v426_v27 }
 0x1e2   : > { %v887_v32 = vpop.eup %886  ;;  %888 = vrcp.f32 %v428_v31 }
 0x1e3   : > { %v510_v33 = vmul.f32 %v887_v32, %v879_v3  ;;  %890 = vrcp.f32 %v588_v34 }
 0x1e5   : > { %782 = vmatmul.msk.f32.vlgmr.msrb.gmra.mxu3 %vm311_vm1, %v510_v33 }
 0x1e8   : > { %v889_v35 = vpop.eup %888 }
 0x1e9   : > { %v430_v36 = vmul.f32 %v889_v35, %v883_v11  ;;  %v891_v37 = vpop.eup %890 }
 0x1ea   : > { %v590_v38 = vmul.f32 %v891_v37, %v881_v10 }
 0x1eb   : > { %779 = vmatmul.msk.f32.vlgmr.msrb.gmra.mxu2 %vm311_vm1, %v430_v36 }
 0x1f3   : > { %785 = vmatmul.msk.f32.vlgmr.msra.gmra.mxu2 %vm311_vm1, %v590_v38 }
 0x260   : > { %v379_v39 = vpop.f32.mrf.mxu2 }
 0x261   : > { %382 = vst.msk [vmem:[#allocation2] sm:$0xff] %vm311_vm1, %v379_v39 }
 0x268   : > { %v534_v40 = vpop.f32.mrf.mxu3 }
 0x269   : > { %538 = vrot.lane.b32.xlu0 %v534_v40, %s1069_s13 }
 0x26e   : > { %v454_v41 = vpop.f32.mrf.mxu2 }
 0x26f   : > { %458 = vrot.lane.b32.xlu2 %v454_v41, %s1070_s26 }
 0x276   : > { %v614_v42 = vpop.f32.mrf.mxu2 }
 0x277   : > { %618 = vrot.lane.b32.xlu1 %v614_v42, %s1071_s17 }
 0x2c9   : > { %v459_v43 = vpop.permute.xlu2 %458 }
 0x2ca   : > { %462 = vst.msk [vmem:[#allocation2] sm:$0xff] %vm461_vm2, %v459_v43 }
 0x2db   : > { %v539_v48 = vpop.permute.xlu0 %538 }
 0x2dc   : > { %542 = vst.msk [vmem:[#allocation2] sm:$0xff] %vm541_vm3, %v539_v48 }
 0x2e9   : > { %v619_v49 = vpop.permute.xlu1 %618 }
 0x2ea   : > { %622 = vst.msk [vmem:[#allocation2] sm:$0xff] %vm621_vm4, %v619_v49 }
 0x2f1   : > { %v623_v50 = vld [vmem:[#allocation2] sm:$0xff] }
 0x2f2   : > { %786 = vmatmul.msk.f32.vlgmr.msra.gmra.mxu1 %vm284_vm0, %v623_v50 }
 0x36f   : > { %v652_v52 = vpop.f32.mrf.mxu1 }
 0x370   : > { %v653_v53 = vadd.f32 %v875_v51, %v652_v52 }
 0x372   : > { %655 = vst.msk [vmem:[%s274_s28] sm:$0xff] %vm284_vm0, %v653_v53 }
 0x373   : > { %1009 = shalt.err (!%p1006_p9)
}
 0x374   : > { %801 = dma.vmem_to_hbm [thread:$0]  (%p1171_p4), %s670_s29, 128, %s672_s30, %s657_s25  }
 0x375 PF: > { %s683_s22 = sand.u32 1, %s1040_s18   ;;  %p1293_p10 = scmp.ge.s32.totalorder %s1052_s21, 2 }
 0x376   : > { %s684_s9 = scalar_lea.sflag [#allocation5], %s683_s22 }
 0x377   : > { %p815_p13 = pnand %p1293_p10, %p1175_p6 }
 0x379   : > { %p816_p11 = pneg %p815_p13 }
 0x37b   : > { %1035 = dma.done.wait (%p816_p11), %s684_s9, 128  }
 0x37c   : > { %1037 = vsyncadd (%p816_p11), %s684_s9, 4294967168  ;;  %p19_p0 = scmp.ge.s32.totalorder %s1145_s12, 4   ;;  %s1294_s18 = smov %s1044_s19 }
 0x37d   : > { %s1295_s19 = smov %s1048_s20  ;;  %s1296_s20 = smov %s1156_s15 }
 0x37e   : > { %s1297_s21 = smov %s1145_s12  ;;  %21 = sbr.rel (!%p19_p0) target bundleno = 6 (0x6), region = 93 }
 0x383   :  { %690 = vsyncpa [#allocation4], 1 }
 0x384   :  { %692 = vsyncpa [#allocation4 + $0x1], 1 }
 0x385   :  { %693 = vsyncpa [#allocation7], 1 }
 0x386   :  { %694 = vsyncpa [#allocation5], 1 }
 0x387   :  { %696 = vsyncpa [#allocation5 + $0x1], 1 }

</bundles_post_ra>
